<compile_context>
chip_gen: v6e
topology: v6e:2x2x1
jax: 0.10.0
libtpu: 0.0.40
codegen_flags: <defaults>
</compile_context>

<pallas_src>
import math
import jax
import jax.numpy as jnp
from jax.experimental import pallas as pl
from jax.experimental.pallas import tpu as pltpu

_IN_FEATURES = 28 * 28   # 784
_HIDDEN = 256


def _round_up(v, m):
    return -(-v // m) * m


def encoder_kernel(x_ref, w1_ref, b1_ref, wh_ref, bh_ref, out_ref):
    # Layer 1: in-kernel bf16 cast of x, bf16 x bf16 -> f32 accumulate on the MXU.
    x_bf16 = x_ref[...].astype(jnp.bfloat16)
    h = jnp.dot(x_bf16, w1_ref[...], preferred_element_type=jnp.float32)
    h = jnp.maximum(h + b1_ref[...], 0.0)                     # bias + ReLU in f32 (VPU)
    # Fused heads: single (256, head_lanes) bf16 weight = [Wm || Wv || zero-pad].
    out = jnp.dot(h.astype(jnp.bfloat16), wh_ref[...],
                  preferred_element_type=jnp.float32)
    out_ref[...] = (out + bh_ref[...]).astype(out_ref.dtype)  # lane-dense bf16 store


def prepare_encoder_params(params):
    """One-time weight prep (do NOT call per forward): bf16 casts, fused head concat+pad."""
    latent_dim = params["wm"].shape[1]
    head_lanes = _round_up(2 * latent_dim, 128)               # lane-dense, never negative pad
    pad = head_lanes - 2 * latent_dim
    wh = jnp.pad(jnp.concatenate([params["wm"], params["wv"]], axis=1),
                 ((0, 0), (0, pad))).astype(jnp.bfloat16)     # (256, head_lanes) bf16
    bh = jnp.pad(jnp.concatenate([params["bm"], params["bv"]], axis=1),
                 ((0, 0), (0, pad)))                          # (1, head_lanes)   f32
    # TODO(synk): optional fp8 (e4m3 + scale) quantization of w1 on v7x-only MXUs.
    return {
        "w1": params["w1"].astype(jnp.bfloat16),              # (784, 256) bf16
        "b1": params["b1"],                                   # (1, 256)   f32
        "wh": wh,
        "bh": bh,
        "latent_dim": latent_dim,
        "head_lanes": head_lanes,
    }


def _choose_tile_m(B):
    # Multiples of 16 rows (bf16 sublane packing after the in-kernel cast), cap 1024.
    # For B >= 32, aim for >= 2 grid steps so v7x megacore can shard the batch axis.
    if B >= 32:
        tile = _round_up(-(-B // 2), 16)
    else:
        tile = _round_up(B, 16)
    return min(1024, tile)


def mlp_encoder_forward(x_nchw, prepared):
    """x_nchw: (B, 1, 28, 28) float32.  `prepared` from prepare_encoder_params().
    Returns (mean, log_var) as float32."""
    B = x_nchw.shape[0]
    latent_dim = prepared["latent_dim"]
    head_lanes = prepared["head_lanes"]

    # nn.Flatten(): reshape only; dtype stays f32 (cast happens inside the kernel).
    x2d = x_nchw.reshape(B, -1)                               # (B, 784) f32

    tile_m = _choose_tile_m(B)
    padded_B = _round_up(B, tile_m)
    if padded_B != B:
        x2d = jnp.pad(x2d, ((0, padded_B - B), (0, 0)))
    grid = (padded_B // tile_m,)

    out = pl.pallas_call(
        encoder_kernel,
        out_shape=jax.ShapeDtypeStruct((padded_B, head_lanes), jnp.bfloat16),
        grid_spec=pltpu.PrefetchScalarGridSpec(
            num_scalar_prefetch=0,
            grid=grid,
            in_specs=[
                pl.BlockSpec((tile_m, _IN_FEATURES), lambda i: (i, 0)),   # x tile (streamed)
                pl.BlockSpec((_IN_FEATURES, _HIDDEN), lambda i: (0, 0)),  # w1 (resident)
                pl.BlockSpec((1, _HIDDEN), lambda i: (0, 0)),             # b1 (resident)
                pl.BlockSpec((_HIDDEN, head_lanes), lambda i: (0, 0)),    # fused head W
                pl.BlockSpec((1, head_lanes), lambda i: (0, 0)),          # fused head b
            ],
            out_specs=pl.BlockSpec((tile_m, head_lanes), lambda i: (i, 0)),
        ),
        compiler_params=pltpu.CompilerParams(
            dimension_semantics=("parallel",)),   # megacore sharding on v7x; no-op on v5e/v6e
    )(x2d, prepared["w1"], prepared["b1"], prepared["wh"], prepared["bh"])

    out = out[:B]
    mean = out[:, :latent_dim].astype(jnp.float32)
    log_var = out[:, latent_dim:2 * latent_dim].astype(jnp.float32)
    return mean, log_var


def init_params(key, latent_dim=2):
    """Deterministic init mimicking PyTorch nn.Linear default (U[-1/sqrt(fan_in), +])."""
    def linear(k, fan_in, fan_out):
        kw, kb = jax.random.split(k)
        bound = 1.0 / math.sqrt(fan_in)
        w = jax.random.uniform(kw, (fan_in, fan_out), jnp.float32, -bound, bound)
        b = jax.random.uniform(kb, (1, fan_out), jnp.float32, -bound, bound)
        return w, b

    k1, k2, k3 = jax.random.split(key, 3)
    w1, b1 = linear(k1, _IN_FEATURES, _HIDDEN)
    wm, bm = linear(k2, _HIDDEN, latent_dim)
    wv, bv = linear(k3, _HIDDEN, latent_dim)
    return {"w1": w1, "b1": b1, "wm": wm, "bm": bm, "wv": wv, "bv": bv}


def _reference(x_nchw, p):
    x2d = x_nchw.reshape(x_nchw.shape[0], -1)
    h = jnp.maximum(x2d @ p["w1"] + p["b1"], 0.0)
    return h @ p["wm"] + p["bm"], h @ p["wv"] + p["bv"]


if __name__ == "__main__":
    key = jax.random.PRNGKey(0)
    k_params, k_x = jax.random.split(key)

    latent_dim = 2
    B = 8
    params = init_params(k_params, latent_dim=latent_dim)
    prepared = prepare_encoder_params(params)        # one-time weight prep (cached)
    x = jax.random.normal(k_x, (B, 1, 28, 28), jnp.float32)  # NCHW like PyTorch

    mean, log_var = mlp_encoder_forward(x, prepared)
    jax.block_until_ready((mean, log_var))

    # Sanity check against pure-JAX f32 reference.
    # Tolerance relaxed: bf16 inputs/weights on the MXU (f32 accumulate) + bf16 output store.
    ref_mean, ref_logvar = _reference(x, params)
    assert mean.shape == (B, latent_dim) and log_var.shape == (B, latent_dim)
    assert jnp.allclose(mean, ref_mean, atol=2e-2, rtol=2e-2)
    assert jnp.allclose(log_var, ref_logvar, atol=2e-2, rtol=2e-2)

    print("KERNEL_OK")
</pallas_src>

<mosaic_0001>
module attributes {stable_mosaic.version = 11 : i64} {
  func.func @encoder_kernel(%arg0: i32, %arg1: memref<16x784xf32, #tpu.memory_space<vmem>>, %arg2: memref<784x256xbf16, #tpu.memory_space<vmem>>, %arg3: memref<1x256xf32, #tpu.memory_space<vmem>>, %arg4: memref<256x128xbf16, #tpu.memory_space<vmem>>, %arg5: memref<1x128xf32, #tpu.memory_space<vmem>>, %arg6: memref<16x128xbf16, #tpu.memory_space<vmem>>) attributes {dimension_semantics = [#tpu.dimension_semantics<parallel>], iteration_bounds = array<i64: 1>, scalar_prefetch = 0 : i64, scratch_operands = 0 : i64, tpu.core_type = #tpu.core_type<tc>, window_params = [{transform_indices = @transform_0, window_bounds = array<i64: 16, 784>}, {pipeline_mode = #tpu.pipeline_mode<synchronous>, transform_indices = @transform_1, window_bounds = array<i64: 784, 256>}, {pipeline_mode = #tpu.pipeline_mode<synchronous>, transform_indices = @transform_2, window_bounds = array<i64: 1, 256>}, {pipeline_mode = #tpu.pipeline_mode<synchronous>, transform_indices = @transform_3, window_bounds = array<i64: 256, 128>}, {pipeline_mode = #tpu.pipeline_mode<synchronous>, transform_indices = @transform_4, window_bounds = array<i64: 1, 128>}, {transform_indices = @transform_5, window_bounds = array<i64: 16, 128>}]} {
    %c0 = arith.constant 0 : index
    %c0_0 = arith.constant 0 : index
    %0 = vector.load %arg1[%c0, %c0_0] : memref<16x784xf32, #tpu.memory_space<vmem>>, vector<16x784xf32>
    %1 = arith.truncf %0 : vector<16x784xf32> to vector<16x784xbf16>
    %c0_1 = arith.constant 0 : index
    %c0_2 = arith.constant 0 : index
    %2 = vector.load %arg2[%c0_1, %c0_2] : memref<784x256xbf16, #tpu.memory_space<vmem>>, vector<784x256xbf16>
    %cst = arith.constant dense<0.000000e+00> : vector<16x256xf32>
    %3 = tpu.matmul %1, %2, %cst {dimension_numbers = #tpu.dot_dimension_numbers<[1], [0], [0], [1], [0, 0, 1, 1], [], []>} : vector<16x784xbf16>, vector<784x256xbf16>, vector<16x256xf32> -> vector<16x256xf32>
    %c0_3 = arith.constant 0 : index
    %c0_4 = arith.constant 0 : index
    %4 = vector.load %arg3[%c0_3, %c0_4] : memref<1x256xf32, #tpu.memory_space<vmem>>, vector<1x256xf32>
    %5 = vector.broadcast %4 : vector<1x256xf32> to vector<16x256xf32>
    %6 = arith.addf %3, %5 : vector<16x256xf32>
    %cst_5 = arith.constant 0.000000e+00 : f32
    %7 = vector.broadcast %cst_5 : f32 to vector<16x256xf32>
    %8 = arith.maximumf %6, %7 : vector<16x256xf32>
    %9 = arith.truncf %8 : vector<16x256xf32> to vector<16x256xbf16>
    %c0_6 = arith.constant 0 : index
    %c0_7 = arith.constant 0 : index
    %10 = vector.load %arg4[%c0_6, %c0_7] : memref<256x128xbf16, #tpu.memory_space<vmem>>, vector<256x128xbf16>
    %cst_8 = arith.constant dense<0.000000e+00> : vector<16x128xf32>
    %11 = tpu.matmul %9, %10, %cst_8 {dimension_numbers = #tpu.dot_dimension_numbers<[1], [0], [0], [1], [0, 0, 1, 1], [], []>} : vector<16x256xbf16>, vector<256x128xbf16>, vector<16x128xf32> -> vector<16x128xf32>
    %c0_9 = arith.constant 0 : index
    %c0_10 = arith.constant 0 : index
    %12 = vector.load %arg5[%c0_9, %c0_10] : memref<1x128xf32, #tpu.memory_space<vmem>>, vector<1x128xf32>
    %13 = vector.broadcast %12 : vector<1x128xf32> to vector<16x128xf32>
    %14 = arith.addf %11, %13 : vector<16x128xf32>
    %15 = arith.truncf %14 : vector<16x128xf32> to vector<16x128xbf16>
    %c0_11 = arith.constant 0 : index
    %c0_12 = arith.constant 0 : index
    %16 = vector.load %arg6[%c0_11, %c0_12] : memref<16x128xbf16, #tpu.memory_space<vmem>>, vector<16x128xbf16>
    tpu.vector_store %arg6[%c0_11, %c0_12], %15 {strides = array<i32>} : memref<16x128xbf16, #tpu.memory_space<vmem>>, vector<16x128xbf16>,
    return
  }
  func.func @transform_0(%arg0: i32) -> (i32, i32) {
    %c0_i32 = arith.constant 0 : i32
    %c0_i32_0 = arith.constant 0 : i32
    return %arg0, %c0_i32 : i32, i32
  }
  func.func @transform_1(%arg0: i32) -> (i32, i32) {
    %c0_i32 = arith.constant 0 : i32
    %c0_i32_0 = arith.constant 0 : i32
    %c0_i32_1 = arith.constant 0 : i32
    return %c0_i32, %c0_i32_0 : i32, i32
  }
  func.func @transform_2(%arg0: i32) -> (i32, i32) {
    %c0_i32 = arith.constant 0 : i32
    %c0_i32_0 = arith.constant 0 : i32
    %c0_i32_1 = arith.constant 0 : i32
    return %c0_i32, %c0_i32_0 : i32, i32
  }
  func.func @transform_3(%arg0: i32) -> (i32, i32) {
    %c0_i32 = arith.constant 0 : i32
    %c0_i32_0 = arith.constant 0 : i32
    %c0_i32_1 = arith.constant 0 : i32
    return %c0_i32, %c0_i32_0 : i32, i32
  }
  func.func @transform_4(%arg0: i32) -> (i32, i32) {
    %c0_i32 = arith.constant 0 : i32
    %c0_i32_0 = arith.constant 0 : i32
    %c0_i32_1 = arith.constant 0 : i32
    return %c0_i32, %c0_i32_0 : i32, i32
  }
  func.func @transform_5(%arg0: i32) -> (i32, i32) {
    %c0_i32 = arith.constant 0 : i32
    %c0_i32_0 = arith.constant 0 : i32
    return %arg0, %c0_i32 : i32, i32
  }
}

</mosaic_0001>

<bundles_post_ra>
// kernel: tpu_custom_call.1
= control target key start
LH: loop header
LB: loop body
LE: loop exit
PB: predicated region body
PF: predicated region fallthrough
CT: control target
= control target key end

     0   :  { %10 = vsyncpa [#allocation3], 0  ;;  %s1542_s0 = inlined_call_operand.hbm [shape: f32[16,784], index: 0, kind: input, shape index: {}]   ;;  %s1543_s1 = inlined_call_operand.hbm [shape: bf16[784,256], index: 1, kind: input, shape index: {}]   ;;  %s1544_s2 = inlined_call_operand.vmem [shape: f32[1,256], index: 2, kind: input, shape index: {}]   ;;  %s1545_s3 = inlined_call_operand.hbm [shape: bf16[256,128], index: 3, kind: input, shape index: {}]   ;;  %s1546_s4 = inlined_call_operand.vmem [shape: f32[1,128], index: 4, kind: input, shape index: {}]   ;;  %s1547_s5 = inlined_call_operand.hbm [shape: bf16[16,128], index: 5, kind: output, shape index: {}]  }
   0x1   :  { %11 = vsyncpa [#allocation6], 0 }
   0x2   :  { %12 = vsyncpa [#allocation4], 0  ;;  %s1477_s18 = smov [#allocation5]  }
   0x3   :  { %s30_s19 = sshll.u32 %s1477_s18, 4  ;;  %s31_s19 = int_to_ptr.vmem [resolvable:$true] %s30_s19 }
   0x4   :  { %s1399_s20 = scalar_lea.vmem %s31_s19, 12544  ;;  %p1404_p1 = scmp.lt.s32.totalorder %s31_s19, %s31_s19 }
   0x5   :  { %p1400_p0 = scmp.ne.s32.totalorder %s31_s19, %s1399_s20  ;;  %p1405_p2 = scmp.lt.s32.totalorder %s1399_s20, %s1399_s20 }
   0x7   :  { %p1406_p3 = por %p1405_p2, %p1404_p1 }
   0x9   :  { %p1407_p4 = pnand %p1406_p3, %p1400_p0 }
   0xb   :  { %1410 = shalt.err (!%p1407_p4)
}
   0xc   :  { %s1478_s21 = smov 128   ;;  %s1479_s22 = smov 8  }
   0xd   :  { %36 = dma.hbm_to_vmem [thread:$0]  %s1543_s1, 12544, %s31_s19, [#allocation6], %s1478_s21, %s1478_s21, %s1479_s22  }
   0xe   :  { %s1480_s25 = smov [#allocation2]  }
   0xf   :  { %s18_s26 = sshll.u32 %s1480_s25, 4  ;;  %s19_s26 = int_to_ptr.vmem [resolvable:$true] %s18_s26 }
  0x10   :  { %s1419_s27 = scalar_lea.vmem %s19_s26, 1792  ;;  %p1424_p6 = scmp.lt.s32.totalorder %s19_s26, %s19_s26 }
  0x11   :  { %p1420_p5 = scmp.ne.s32.totalorder %s19_s26, %s1419_s27  ;;  %p1425_p7 = scmp.lt.s32.totalorder %s1419_s27, %s1419_s27 }
  0x13   :  { %p1426_p8 = por %p1425_p7, %p1424_p6 }
  0x15   :  { %p1427_p9 = pnand %p1426_p8, %p1420_p5 }
  0x17   :  { %1430 = shalt.err (!%p1427_p9)
}
  0x18   :  { %s1481_s28 = smov 896   ;;  %s1482_s29 = smov 56  }
  0x19   :  { %24 = dma.hbm_to_vmem [thread:$0]  %s1542_s0, 1792, %s19_s26, [#allocation3], %s1481_s28, %s1481_s28, %s1482_s29  }
  0x1a   :  { %s1483_s7 = smov [#allocation7]  }
  0x1b   :  { %s44_s8 = sshll.u32 %s1483_s7, 4  ;;  %s45_s8 = int_to_ptr.vmem [resolvable:$true] %s44_s8 }
  0x1c   :  { %s1439_s1 = scalar_lea.vmem %s45_s8, 2048  ;;  %p1444_p11 = scmp.lt.s32.totalorder %s45_s8, %s45_s8 }
  0x1d   :  { %p1440_p10 = scmp.ne.s32.totalorder %s45_s8, %s1439_s1  ;;  %p1445_p12 = scmp.lt.s32.totalorder %s1439_s1, %s1439_s1 }
  0x1f   :  { %p1446_p13 = por %p1445_p12, %p1444_p11 }
  0x21   :  { %p1447_p0 = pnand %p1446_p13, %p1440_p10 }
  0x23   :  { %1450 = shalt.err (!%p1447_p0)
}
  0x24   :  { %s1484_s9 = smov 64   ;;  %s1485_s10 = smov 4  }
  0x25   :  { %50 = dma.hbm_to_vmem [thread:$0]  %s1545_s3, 2048, %s45_s8, [#allocation6], %s1484_s9, %s1484_s9, %s1485_s10  }
  0x26   :  { %1471 = dma.done.wait [#allocation3], 1792  }
  0x27   :  { %1472 = vsyncadd [#allocation3], 4294965504 }
  0x28   :  { %1473 = dma.done.wait [#allocation6], 14592  }
  0x29   :  { %1474 = vsyncadd [#allocation6], 4294952704  ;;  %v1228_v0 = vld [vmem:[#allocation5 + $0x74] ss:$8 sps:$4 sm:$0xff]   ;;  %v1230_v1 = vld [vmem:[#allocation5 + $0x70] ss:$8 sps:$4 sm:$0xff]  }
  0x2a   :  { %688 = vmatprep.subr.bf16.mxu0 %v1228_v0  ;;  %v1231_v2 = vld [vmem:[#allocation5 + $0x174] ss:$8 sps:$4 sm:$0xff]   ;;  %v1233_v3 = vld [vmem:[#allocation5 + $0x170] ss:$8 sps:$4 sm:$0xff]   ;;  %v1234_v4 = vld [vmem:[#allocation5 + $0x64] ss:$8 sps:$4 sm:$0xff]  }
  0x2b   :  { %689 = vmatpush1.bf16.msra.mxu0 %v1230_v1  ;;  %v1236_v5 = vld [vmem:[#allocation5 + $0x60] ss:$8 sps:$4 sm:$0xff]   ;;  %731 = vmatprep.subr.bf16.mxu1 %v1231_v2  ;;  %v1237_v6 = vld [vmem:[#allocation5 + $0x164] ss:$8 sps:$4 sm:$0xff]   ;;  %v1240_v8 = vld [vmem:[#allocation5 + $0x54] ss:$8 sps:$4 sm:$0xff]  }
  0x2c   :  { %732 = vmatpush1.bf16.msra.mxu1 %v1233_v3  ;;  %690 = vmatprep.subr.bf16.mxu0 %v1234_v4  ;;  %v1239_v7 = vld [vmem:[#allocation5 + $0x160] ss:$8 sps:$4 sm:$0xff]   ;;  %v1242_v9 = vld [vmem:[#allocation5 + $0x50] ss:$8 sps:$4 sm:$0xff]   ;;  %v1243_v10 = vld [vmem:[#allocation5 + $0x154] ss:$8 sps:$4 sm:$0xff]  }
  0x2d   :  { %733 = vmatprep.subr.bf16.mxu1 %v1237_v6  ;;  %v1246_v11 = vld [vmem:[#allocation5 + $0x44] ss:$8 sps:$4 sm:$0xff]   ;;  %v1245_v12 = vld [vmem:[#allocation5 + $0x150] ss:$8 sps:$4 sm:$0xff]   ;;  %v1248_v14 = vld [vmem:[#allocation5 + $0x40] ss:$8 sps:$4 sm:$0xff]  }
  0x2e   :  { %v1249_v13 = vld [vmem:[#allocation5 + $0x144] ss:$8 sps:$4 sm:$0xff]   ;;  %v1252_v15 = vld [vmem:[#allocation5 + $0x34] ss:$8 sps:$4 sm:$0xff]   ;;  %v1251_v16 = vld [vmem:[#allocation5 + $0x140] ss:$8 sps:$4 sm:$0xff]  }
  0x2f   :  { %691 = vmatpush1.bf16.msra.mxu0 %v1236_v5  ;;  %v1255_v17 = vld [vmem:[#allocation5 + $0x134] ss:$8 sps:$4 sm:$0xff]   ;;  %v1254_v18 = vld [vmem:[#allocation5 + $0x30] ss:$8 sps:$4 sm:$0xff]   ;;  %v1258_v19 = vld [vmem:[#allocation5 + $0x24] ss:$8 sps:$4 sm:$0xff]  }
  0x30   :  { %692 = vmatprep.subr.bf16.mxu0 %v1240_v8  ;;  %734 = vmatpush1.bf16.msra.mxu1 %v1239_v7  ;;  %v1257_v20 = vld [vmem:[#allocation5 + $0x130] ss:$8 sps:$4 sm:$0xff]   ;;  %v1261_v21 = vld [vmem:[#allocation5 + $0x124] ss:$8 sps:$4 sm:$0xff]   ;;  %v1260_v22 = vld [vmem:[#allocation5 + $0x20] ss:$8 sps:$4 sm:$0xff]  }
  0x31   :  { %735 = vmatprep.subr.bf16.mxu1 %v1243_v10  ;;  %v1264_v23 = vld [vmem:[#allocation5 + $0x14] ss:$8 sps:$4 sm:$0xff]   ;;  %v1263_v24 = vld [vmem:[#allocation5 + $0x120] ss:$8 sps:$4 sm:$0xff]   ;;  %v1266_v26 = vld [vmem:[#allocation5 + $0x10] ss:$8 sps:$4 sm:$0xff]  }
  0x32   :  { %v1267_v25 = vld [vmem:[#allocation5 + $0x114] ss:$8 sps:$4 sm:$0xff]   ;;  %v1270_v27 = vld [vmem:[#allocation5 + $0x4] ss:$8 sps:$4 sm:$0xff]   ;;  %v1269_v28 = vld [vmem:[#allocation5 + $0x110] ss:$8 sps:$4 sm:$0xff]  }
  0x33   :  { %693 = vmatpush1.bf16.msra.mxu0 %v1242_v9  ;;  %v1273_v29 = vld [vmem:[#allocation5 + $0x104] ss:$8 sps:$4 sm:$0xff]   ;;  %v1272_v30 = vld [vmem:[#allocation5] ss:$8 sps:$4 sm:$0xff]   ;;  %v1276_v31 = vld [vmem:[#allocation5 + $0xf4] ss:$8 sps:$4 sm:$0xff]  }
  0x34   :  { %694 = vmatprep.subr.bf16.mxu0 %v1246_v11  ;;  %736 = vmatpush1.bf16.msra.mxu1 %v1245_v12  ;;  %v1275_v32 = vld [vmem:[#allocation5 + $0x100] ss:$8 sps:$4 sm:$0xff]   ;;  %v1279_v33 = vld [vmem:[#allocation5 + $0x1f4] ss:$8 sps:$4 sm:$0xff]   ;;  %v1278_v34 = vld [vmem:[#allocation5 + $0xf0] ss:$8 sps:$4 sm:$0xff]  }
  0x35   :  { %737 = vmatprep.subr.bf16.mxu1 %v1249_v13  ;;  %v1282_v35 = vld [vmem:[#allocation5 + $0xe4] ss:$8 sps:$4 sm:$0xff]   ;;  %v1281_v36 = vld [vmem:[#allocation5 + $0x1f0] ss:$8 sps:$4 sm:$0xff]   ;;  %v1284_v38 = vld [vmem:[#allocation5 + $0xe0] ss:$8 sps:$4 sm:$0xff]  }
  0x36   :  { %v1285_v37 = vld [vmem:[#allocation5 + $0x1e4] ss:$8 sps:$4 sm:$0xff]   ;;  %v1288_v39 = vld [vmem:[#allocation5 + $0xd4] ss:$8 sps:$4 sm:$0xff]   ;;  %v1287_v40 = vld [vmem:[#allocation5 + $0x1e0] ss:$8 sps:$4 sm:$0xff]  }
  0x37   :  { %695 = vmatpush1.bf16.msra.mxu0 %v1248_v14  ;;  %v1291_v41 = vld [vmem:[#allocation5 + $0x1d4] ss:$8 sps:$4 sm:$0xff]   ;;  %v1290_v42 = vld [vmem:[#allocation5 + $0xd0] ss:$8 sps:$4 sm:$0xff]   ;;  %v1294_v43 = vld [vmem:[#allocation5 + $0xc4] ss:$8 sps:$4 sm:$0xff]  }
  0x38   :  { %696 = vmatprep.subr.bf16.mxu0 %v1252_v15  ;;  %738 = vmatpush1.bf16.msra.mxu1 %v1251_v16  ;;  %v1293_v44 = vld [vmem:[#allocation5 + $0x1d0] ss:$8 sps:$4 sm:$0xff]   ;;  %v1297_v45 = vld [vmem:[#allocation5 + $0x1c4] ss:$8 sps:$4 sm:$0xff]   ;;  %v1296_v48 = vld [vmem:[#allocation5 + $0xc0] ss:$8 sps:$4 sm:$0xff]  }
  0x39   :  { %739 = vmatprep.subr.bf16.mxu1 %v1255_v17  ;;  %v64_v46 = vld [vmem:[#allocation2 + $0x8] sm:$0xff]  ;;  %v71_v47 = vld [vmem:[#allocation2 + $0x40] sm:$0xff]  ;;  %v1299_v51 = vld [vmem:[#allocation5 + $0x1c0] ss:$8 sps:$4 sm:$0xff]   ;;  %vm684_vm0 = vcmask 130048   ;;  %s1487_s14 = smov [#allocation8]  }
  0x3a   :  { %v78_v49 = vpack.c.bf16 %v71_v47, %v64_v46  ;;  %v1300_v50 = vld [vmem:[#allocation5 + $0xb4] ss:$8 sps:$4 sm:$0xff]   ;;  %v66_v52 = vld [vmem:[#allocation2 + $0x18] sm:$0xff]  ;;  %v73_v53 = vld [vmem:[#allocation2 + $0x50] sm:$0xff]  ;;  %s1057_s15 = sshll.u32 %s1487_s14, 4  ;;  %s1058_s15 = int_to_ptr.vmem [resolvable:$true] %s1057_s15 }
  0x3b   :  { %697 = vmatpush1.bf16.msra.mxu0 %v1254_v18  ;;  %v1303_v54 = vld [vmem:[#allocation5 + $0x1b4] ss:$8 sps:$4 sm:$0xff]   ;;  %v80_v55 = vpack.c.bf16 %v73_v53, %v66_v52  ;;  %v1302_v56 = vld [vmem:[#allocation5 + $0xb0] ss:$8 sps:$4 sm:$0xff]   ;;  %v1306_v57 = vld [vmem:[#allocation5 + $0xa4] ss:$8 sps:$4 sm:$0xff]   ;;  %p1456_p2 = scmp.lt.s32.totalorder %s1058_s15, %s1058_s15 }
  0x3c   :  { %698 = vmatprep.subr.bf16.mxu0 %v1258_v19  ;;  %740 = vmatpush1.bf16.msra.mxu1 %v1257_v20  ;;  %v1305_v58 = vld [vmem:[#allocation5 + $0x1b0] ss:$8 sps:$4 sm:$0xff]   ;;  %v1309_v59 = vld [vmem:[#allocation5 + $0x1a4] ss:$8 sps:$4 sm:$0xff]   ;;  %v1308_v60 = vld [vmem:[#allocation5 + $0xa0] ss:$8 sps:$4 sm:$0xff]  }
  0x3d   :  { %741 = vmatprep.subr.bf16.mxu1 %v1261_v21  ;;  %720 = vmatprep.mubr.bf16.mxu0 %v78_v49  ;;  %v1312_v61 = vld [vmem:[#allocation5 + $0x94] ss:$8 sps:$4 sm:$0xff]   ;;  %v1311_v62 = vld [vmem:[#allocation5 + $0x1a0] ss:$8 sps:$4 sm:$0xff]   ;;  %v1314_v0 = vld [vmem:[#allocation5 + $0x90] ss:$8 sps:$4 sm:$0xff]  }
  0x3e   :  { %763 = vmatprep.mubr.bf16.mxu1 %v80_v55  ;;  %v1315_v63 = vld [vmem:[#allocation5 + $0x194] ss:$8 sps:$4 sm:$0xff]   ;;  %v1317_v1 = vld [vmem:[#allocation5 + $0x190] ss:$8 sps:$4 sm:$0xff]   ;;  %v1318_v2 = vld [vmem:[#allocation5 + $0x84] ss:$8 sps:$4 sm:$0xff]  }
  0x3f   :  { %699 = vmatpush1.bf16.msra.mxu0 %v1260_v22  ;;  %v1320_v3 = vld [vmem:[#allocation5 + $0x80] ss:$8 sps:$4 sm:$0xff]   ;;  %v1321_v4 = vld [vmem:[#allocation5 + $0x184] ss:$8 sps:$4 sm:$0xff]   ;;  %v63_v5 = vld [vmem:[#allocation2] sm:$0xff]  ;;  %v1486_v21 = vmov 0  }
  0x40   :  { %700 = vmatprep.subr.bf16.mxu0 %v1264_v23  ;;  %742 = vmatpush1.bf16.msra.mxu1 %v1263_v24  ;;  %v1323_v6 = vld [vmem:[#allocation5 + $0x180] ss:$8 sps:$4 sm:$0xff]   ;;  %v1326_v8 = vld [vmem:[#allocation5 + $0x274] ss:$8 sps:$4 sm:$0xff]   ;;  %v1324_v12 = vld [vmem:[#allocation5 + $0x270] ss:$8 sps:$4 sm:$0xff]  }
  0x41   :  { %743 = vmatprep.subr.bf16.mxu1 %v1267_v25  ;;  %v70_v7 = vld [vmem:[#allocation2 + $0x38] sm:$0xff]  ;;  %v65_v9 = vld [vmem:[#allocation2 + $0x10] sm:$0xff]  ;;  %v72_v10 = vld [vmem:[#allocation2 + $0x48] sm:$0xff]  ;;  %s1451_s16 = scalar_lea.vmem %s1058_s15, 128 }
  0x42   :  { %v77_v11 = vpack.c.bf16 %v70_v7, %v63_v5  ;;  %v79_v13 = vpack.c.bf16 %v72_v10, %v65_v9  ;;  %v1329_v14 = vld [vmem:[#allocation5 + $0x264] ss:$8 sps:$4 sm:$0xff]   ;;  %v1369_v15 = vld [vmem:[#allocation5 + $0x300] ss:$8 sps:$4 sm:$0xff]   ;;  %v1332_v18 = vld [vmem:[#allocation5 + $0x254] ss:$8 sps:$4 sm:$0xff]   ;;  %p1452_p1 = scmp.ne.s32.totalorder %s1058_s15, %s1451_s16  ;;  %p1457_p3 = scmp.lt.s32.totalorder %s1451_s16, %s1451_s16 }
  0x43   :  { %701 = vmatpush1.bf16.msra.mxu0 %v1266_v26  ;;  %v1371_v16 = vld [vmem:[#allocation5 + $0x304] ss:$8 sps:$4 sm:$0xff]   ;;  %v1327_v17 = vld [vmem:[#allocation5 + $0x260] ss:$8 sps:$4 sm:$0xff]   ;;  %v68_v19 = vld [vmem:[#allocation2 + $0x28] sm:$0xff] }
  0x44   :  { %702 = vmatprep.subr.bf16.mxu0 %v1270_v27  ;;  %744 = vmatpush1.bf16.msra.mxu1 %v1269_v28  ;;  %v1330_v20 = vld [vmem:[#allocation5 + $0x250] ss:$8 sps:$4 sm:$0xff]   ;;  %v69_v22 = vld [vmem:[#allocation2 + $0x30] sm:$0xff]  ;;  %v1368_v49 = vld [vmem:[#allocation5 + $0x294] ss:$8 sps:$4 sm:$0xff]   ;;  %p1458_p4 = por %p1457_p3, %p1456_p2 }
  0x45   :  { %745 = vmatprep.subr.bf16.mxu1 %v1273_v29  ;;  %v76_v23 = vld [vmem:[#allocation2 + $0x68] sm:$0xff]  ;;  %v75_v24 = vld [vmem:[#allocation2 + $0x60] sm:$0xff]  ;;  %v1335_v25 = vld [vmem:[#allocation5 + $0x244] ss:$8 sps:$4 sm:$0xff]  }
  0x46   :  { %v82_v26 = vpack.c.bf16 %v75_v24, %v68_v19  ;;  %v83_v27 = vpack.c.bf16 %v76_v23, %v69_v22  ;;  %v1333_v28 = vld [vmem:[#allocation5 + $0x240] ss:$8 sps:$4 sm:$0xff]   ;;  %v1338_v29 = vld [vmem:[#allocation5 + $0x234] ss:$8 sps:$4 sm:$0xff]   ;;  %v1360_v46 = vld [vmem:[#allocation5 + $0x2b0] ss:$8 sps:$4 sm:$0xff]   ;;  %p1459_p5 = pnand %p1458_p4, %p1452_p1 }
  0x47   :  { %703 = vmatpush1.bf16.msra.mxu0 %v1272_v30  ;;  %v1336_v30 = vld [vmem:[#allocation5 + $0x230] ss:$8 sps:$4 sm:$0xff]   ;;  %v1365_v47 = vld [vmem:[#allocation5 + $0x2a4] ss:$8 sps:$4 sm:$0xff]   ;;  %v1372_v52 = vld [vmem:[#allocation5 + $0x280] ss:$8 sps:$4 sm:$0xff]  }
  0x48   :  { %704 = vmatprep.subr.bf16.mxu0 %v1276_v31  ;;  %746 = vmatpush1.bf16.msra.mxu1 %v1275_v32  ;;  %v1341_v31 = vld [vmem:[#allocation5 + $0x224] ss:$8 sps:$4 sm:$0xff]   ;;  %v1339_v32 = vld [vmem:[#allocation5 + $0x220] ss:$8 sps:$4 sm:$0xff]   ;;  %v67_v53 = vld [vmem:[#allocation2 + $0x20] sm:$0xff] }
  0x49   :  { %747 = vmatprep.subr.bf16.mxu1 %v1279_v33  ;;  %v1344_v33 = vld [vmem:[#allocation5 + $0x214] ss:$8 sps:$4 sm:$0xff]  }
  0x4a   :  { %v1388_v5 = vld [vmem:[#allocation7 + $0x8] sm:$0xff]   ;;  %v1390_v7 = vld [vmem:[#allocation7] sm:$0xff]  }
  0x4b   :  { %705 = vmatpush2.bf16.msra.mxu0 %v1278_v34  ;;  %v1342_v34 = vld [vmem:[#allocation5 + $0x210] ss:$8 sps:$4 sm:$0xff]  }
  0x4c   :  { %706 = vmatprep.subr.bf16.mxu0 %v1282_v35  ;;  %748 = vmatpush2.bf16.msra.mxu1 %v1281_v36  ;;  %v1347_v35 = vld [vmem:[#allocation5 + $0x204] ss:$8 sps:$4 sm:$0xff]   ;;  %v1345_v36 = vld [vmem:[#allocation5 + $0x200] ss:$8 sps:$4 sm:$0xff]  }
  0x4d   :  { %749 = vmatprep.subr.bf16.mxu1 %v1285_v37  ;;  %v1350_v37 = vld [vmem:[#allocation5 + $0x2f4] ss:$8 sps:$4 sm:$0xff]  }
  0x4f   :  { %707 = vmatpush2.bf16.msra.mxu0 %v1284_v38  ;;  %v1348_v38 = vld [vmem:[#allocation5 + $0x2f0] ss:$8 sps:$4 sm:$0xff]  }
  0x50   :  { %708 = vmatprep.subr.bf16.mxu0 %v1288_v39  ;;  %750 = vmatpush2.bf16.msra.mxu1 %v1287_v40  ;;  %v1353_v39 = vld [vmem:[#allocation5 + $0x2e4] ss:$8 sps:$4 sm:$0xff]   ;;  %v1351_v40 = vld [vmem:[#allocation5 + $0x2e0] ss:$8 sps:$4 sm:$0xff]  }
  0x51   :  { %751 = vmatprep.subr.bf16.mxu1 %v1291_v41  ;;  %v1356_v41 = vld [vmem:[#allocation5 + $0x2d4] ss:$8 sps:$4 sm:$0xff]  }
  0x53   :  { %709 = vmatpush2.bf16.msra.mxu0 %v1290_v42  ;;  %v1354_v42 = vld [vmem:[#allocation5 + $0x2d0] ss:$8 sps:$4 sm:$0xff]  }
  0x54   :  { %710 = vmatprep.subr.bf16.mxu0 %v1294_v43  ;;  %752 = vmatpush2.bf16.msra.mxu1 %v1293_v44  ;;  %v1359_v43 = vld [vmem:[#allocation5 + $0x2c4] ss:$8 sps:$4 sm:$0xff]   ;;  %v1357_v44 = vld [vmem:[#allocation5 + $0x2c0] ss:$8 sps:$4 sm:$0xff]  }
  0x55   :  { %753 = vmatprep.subr.bf16.mxu1 %v1297_v45  ;;  %v1362_v45 = vld [vmem:[#allocation5 + $0x2b4] ss:$8 sps:$4 sm:$0xff]  }
  0x57   :  { %711 = vmatpush2.bf16.msra.mxu0 %v1296_v48  ;;  %v1363_v48 = vld [vmem:[#allocation5 + $0x2a0] ss:$8 sps:$4 sm:$0xff]  }
  0x58   :  { %712 = vmatprep.subr.bf16.mxu0 %v1300_v50  ;;  %754 = vmatpush2.bf16.msra.mxu1 %v1299_v51  ;;  %v1366_v50 = vld [vmem:[#allocation5 + $0x290] ss:$8 sps:$4 sm:$0xff]   ;;  %v1374_v51 = vld [vmem:[#allocation5 + $0x284] ss:$8 sps:$4 sm:$0xff]  }
  0x59   :  { %755 = vmatprep.subr.bf16.mxu1 %v1303_v54  ;;  %v74_v54 = vld [vmem:[#allocation2 + $0x58] sm:$0xff] }
  0x5a   :  { %v81_v55 = vpack.c.bf16 %v74_v54, %v67_v53 }
  0x5b   :  { %713 = vmatpush2.bf16.msra.mxu0 %v1302_v56  ;;  %v1375_v56 = vld [vmem:[#allocation7 + $0x78] sm:$0xff]  }
  0x5c   :  { %714 = vmatprep.subr.bf16.mxu0 %v1306_v57  ;;  %756 = vmatpush2.bf16.msra.mxu1 %v1305_v58  ;;  %v1376_v57 = vld [vmem:[#allocation7 + $0x38] sm:$0xff]   ;;  %v1377_v58 = vld [vmem:[#allocation7 + $0x70] sm:$0xff]  }
  0x5d   :  { %757 = vmatprep.subr.bf16.mxu1 %v1309_v59  ;;  %v1378_v59 = vld [vmem:[#allocation7 + $0x30] sm:$0xff]  }
  0x5f   :  { %715 = vmatpush2.bf16.msra.mxu0 %v1308_v60  ;;  %v1379_v60 = vld [vmem:[#allocation7 + $0x68] sm:$0xff]  }
  0x60   :  { %716 = vmatprep.subr.bf16.mxu0 %v1312_v61  ;;  %758 = vmatpush2.bf16.msra.mxu1 %v1311_v62  ;;  %v1380_v61 = vld [vmem:[#allocation7 + $0x28] sm:$0xff]   ;;  %v1381_v62 = vld [vmem:[#allocation7 + $0x60] sm:$0xff]  }
  0x61   :  { %759 = vmatprep.subr.bf16.mxu1 %v1315_v63  ;;  %v1382_v63 = vld [vmem:[#allocation7 + $0x20] sm:$0xff]  }
  0x63   :  { %717 = vmatpush2.bf16.msra.mxu0 %v1314_v0  ;;  %v1383_v0 = vld [vmem:[#allocation7 + $0x58] sm:$0xff]  }
  0x64   :  { %718 = vmatprep.subr.bf16.mxu0 %v1318_v2  ;;  %760 = vmatpush2.bf16.msra.mxu1 %v1317_v1  ;;  %v1384_v1 = vld [vmem:[#allocation7 + $0x18] sm:$0xff]   ;;  %v1385_v2 = vld [vmem:[#allocation7 + $0x50] sm:$0xff]  }
  0x65   :  { %761 = vmatprep.subr.bf16.mxu1 %v1321_v4  ;;  %v1387_v4 = vld [vmem:[#allocation7 + $0x48] sm:$0xff]  }
  0x67   :  { %719 = vmatpush2.bf16.msra.mxu0 %v1320_v3  ;;  %v1386_v3 = vld [vmem:[#allocation7 + $0x10] sm:$0xff]  }
  0x68   :  { %774 = vmatprep.subr.bf16.mxu0 %v1326_v8  ;;  %762 = vmatpush2.bf16.msra.mxu1 %v1323_v6  ;;  %v1389_v6 = vld [vmem:[#allocation7 + $0x40] sm:$0xff]   ;;  %v184_v8 = vlaneseq }
  0x69   :  { %831 = vmatprep.subr.bf16.mxu1 %v1371_v16 }
  0x6a   :  { %721 = vmatmul.mubr.bf16.vlgmr.msra.gmra.mxu0 %v77_v11  ;;  %v185_v10 = vshrl.u32 %v184_v8, 7 }
  0x6b   :  { %775 = vmatpush1.bf16.msra.mxu0 %v1324_v12  ;;  %764 = vmatmul.mubr.bf16.vlgmr.msra.gmra.mxu1 %v79_v13 }
  0x6c   :  { %776 = vmatprep.subr.bf16.mxu0 %v1329_v14  ;;  %849 = vmatprep.mubr.bf16.mxu1 %v1486_v21  ;;  %v190_v13 = vsub.s32 1, %v185_v10  ;;  %v182_v14 = vld [vmem:[%s1544_s2] sm:$0x3] }
  0x6d   :  { %832 = vmatpush1.bf16.msra.mxu1 %v1369_v15  ;;  %806 = vmatprep.mubr.bf16.mxu0 %v82_v26  ;;  %v186_v15 = vsub.s32 0, %v185_v10 }
  0x6e   :  { %1195 = vmatprep.subr.bf16.mxu1 %v1375_v56 }
  0x6f   :  { %777 = vmatpush1.bf16.msra.mxu0 %v1327_v17  ;;  %v187_v19 = vrot.slane %v182_v14, %v186_v15 }
  0x70   :  { %778 = vmatprep.subr.bf16.mxu0 %v1332_v18  ;;  %v191_v18 = vrot.slane %v182_v14, %v190_v13 }
  0x73   :  { %779 = vmatpush1.bf16.msra.mxu0 %v1330_v20  ;;  %1168 = vmatmul.mubr.msk.bf16.vlgmr.msra.gmra.mxu1 %vm684_vm0, %v83_v27 }
  0x74   :  { %780 = vmatprep.subr.bf16.mxu0 %v1335_v25  ;;  %1196 = vmatpush3.bf16.msra.mxu1 %v1376_v57  ;;  %v1169_v57 = vld [vmem:[%s1546_s4] ss:$0 sm:$0xff] }
  0x75   :  { %1197 = vmatprep.subr.bf16.mxu1 %v1377_v58 }
  0x77   :  { %781 = vmatpush1.bf16.msra.mxu0 %v1333_v28 }
  0x78   :  { %782 = vmatprep.subr.bf16.mxu0 %v1338_v29  ;;  %1198 = vmatpush3.bf16.msra.mxu1 %v1378_v59 }
  0x79   :  { %1199 = vmatprep.subr.bf16.mxu1 %v1379_v60 }
  0x7b   :  { %783 = vmatpush1.bf16.msra.mxu0 %v1336_v30 }
  0x7c   :  { %784 = vmatprep.subr.bf16.mxu0 %v1341_v31  ;;  %1200 = vmatpush3.bf16.msra.mxu1 %v1380_v61 }
  0x7d   :  { %1201 = vmatprep.subr.bf16.mxu1 %v1381_v62 }
  0x7f   :  { %785 = vmatpush1.bf16.msra.mxu0 %v1339_v32 }
  0x80   :  { %786 = vmatprep.subr.bf16.mxu0 %v1344_v33  ;;  %1202 = vmatpush3.bf16.msra.mxu1 %v1382_v63 }
  0x81   :  { %1203 = vmatprep.subr.bf16.mxu1 %v1383_v0 }
  0x83   :  { %787 = vmatpush1.bf16.msra.mxu0 %v1342_v34 }
  0x84   :  { %788 = vmatprep.subr.bf16.mxu0 %v1347_v35  ;;  %1204 = vmatpush3.bf16.msra.mxu1 %v1384_v1 }
  0x85   :  { %1205 = vmatprep.subr.bf16.mxu1 %v1385_v2 }
  0x87   :  { %789 = vmatpush1.bf16.msra.mxu0 %v1345_v36 }
  0x88   :  { %790 = vmatprep.subr.bf16.mxu0 %v1350_v37  ;;  %1206 = vmatpush3.bf16.msra.mxu1 %v1386_v3 }
  0x89   :  { %1207 = vmatprep.subr.bf16.mxu1 %v1387_v4 }
  0x8b   :  { %791 = vmatpush2.bf16.msra.mxu0 %v1348_v38 }
  0x8c   :  { %792 = vmatprep.subr.bf16.mxu0 %v1353_v39  ;;  %1208 = vmatpush3.bf16.msra.mxu1 %v1388_v5 }
  0x8d   :  { %1209 = vmatprep.subr.bf16.mxu1 %v1389_v6 }
  0x8f   :  { %793 = vmatpush2.bf16.msra.mxu0 %v1351_v40 }
  0x90   :  { %794 = vmatprep.subr.bf16.mxu0 %v1356_v41  ;;  %1210 = vmatpush3.bf16.msra.mxu1 %v1390_v7 }
  0x93   :  { %795 = vmatpush2.bf16.msra.mxu0 %v1354_v42 }
  0x94   :  { %796 = vmatprep.subr.bf16.mxu0 %v1359_v43 }
  0x97   :  { %797 = vmatpush2.bf16.msra.mxu0 %v1357_v44 }
  0x98   :  { %798 = vmatprep.subr.bf16.mxu0 %v1362_v45 }
  0x9b   :  { %799 = vmatpush2.bf16.msra.mxu0 %v1360_v46 }
  0x9c   :  { %800 = vmatprep.subr.bf16.mxu0 %v1365_v47 }
  0x9f   :  { %801 = vmatpush2.bf16.msra.mxu0 %v1363_v48 }
  0xa0   :  { %802 = vmatprep.subr.bf16.mxu0 %v1368_v49 }
  0xa3   :  { %803 = vmatpush2.bf16.msra.mxu0 %v1366_v50 }
  0xa4   :  { %804 = vmatprep.subr.bf16.mxu0 %v1374_v51 }
  0xa7   :  { %805 = vmatpush2.bf16.msra.mxu0 %v1372_v52 }
  0xaa   :  { %807 = vmatmul.mubr.bf16.vlgmr.msra.gmra.mxu0 %v81_v55 }
 0x12a   :  { %v722_v11 = vpop.f32.mrf.mxu0 }
 0x12b   :  { %v765_v9 = vpop.f32.mrf.mxu1  ;;  %v723_v24 = vadd.f32 %v722_v11, %v187_v19 }
 0x12c   :  { %v724_v16 = vpop.f32.mrf.mxu0 }
 0x12d   :  { %v767_v12 = vpop.f32.mrf.mxu1  ;;  %v725_v23 = vadd.f32 %v724_v16, %v191_v18  ;;  %v766_v31 = vadd.f32 %v765_v9, %v723_v24 }
 0x12e   :  { %v726_v20 = vpop.f32.mrf.mxu0 }
 0x12f   :  { %v769_v17 = vpop.f32.mrf.mxu1  ;;  %v727_v26 = vadd.f32 %v726_v20, %v187_v19  ;;  %v768_v29 = vadd.f32 %v767_v12, %v725_v23 }
 0x130   :  { %v728_v25 = vpop.f32.mrf.mxu0 }
 0x131   :  { %v771_v21 = vpop.f32.mrf.mxu1  ;;  %v729_v30 = vadd.f32 %v728_v25, %v191_v18  ;;  %v770_v33 = vadd.f32 %v769_v17, %v727_v26 }
 0x133   :  { %v851_v22 = vpop.f32.mrf.mxu1  ;;  %v772_v38 = vadd.f32 %v771_v21, %v729_v30 }
 0x135   :  { %v853_v27 = vpop.f32.mrf.mxu1 }
 0x137   :  { %v855_v36 = vpop.f32.mrf.mxu1 }
 0x139   :  { %v857_v45 = vpop.f32.mrf.mxu1 }
 0x16a   :  { %v808_v28 = vpop.f32.mrf.mxu0 }
 0x16b   :  { %v809_v35 = vadd.f32 %v808_v28, %v766_v31 }
 0x16c   :  { %v810_v32 = vpop.f32.mrf.mxu0 }
 0x16d   :  { %v811_v34 = vadd.f32 %v810_v32, %v768_v29  ;;  %v852_v44 = vadd.f32 %v851_v22, %v809_v35 }
 0x16e   :  { %v812_v37 = vpop.f32.mrf.mxu0 }
 0x16f   :  { %v813_v39 = vadd.f32 %v812_v37, %v770_v33  ;;  %v854_v41 = vadd.f32 %v853_v27, %v811_v34  ;;  %v860_v50 = vmax.f32 %v852_v44, 0.0 }
 0x170   :  { %v814_v40 = vpop.f32.mrf.mxu0 }
 0x171   :  { %v856_v42 = vadd.f32 %v855_v36, %v813_v39  ;;  %v815_v43 = vadd.f32 %v814_v40, %v772_v38  ;;  %v861_v48 = vmax.f32 %v854_v41, 0.0 }
 0x173   :  { %v858_v46 = vadd.f32 %v857_v45, %v815_v43  ;;  %v862_v47 = vmax.f32 %v856_v42, 0.0 }
 0x175   :  { %v863_v49 = vmax.f32 %v858_v46, 0.0  ;;  %v864_v52 = vpack.c.bf16 %v862_v47, %v860_v50 }
 0x177   :  { %v865_v51 = vpack.c.bf16 %v863_v49, %v861_v48 }
 0x179   :  { %1033 = vmatprep.mubr.bf16.mxu1 %v865_v51 }
 0x17a   :  { %1034 = vmatmul.mubr.bf16.vlgmr.msra.gmra.mxu1 %v864_v52 }
 0x23a   :  { %v1211_v53 = vpop.f32.mrf.mxu1 }
 0x23c   :  { %v1212_v54 = vpop.f32.mrf.mxu1 }
 0x23d   :  { %v1213_v56 = vadd.f32 %v1212_v54, %v1211_v53 }
 0x23e   :  { %v1214_v55 = vpop.f32.mrf.mxu1 }
 0x23f   :  { %v1036_v60 = vadd.f32 %v1213_v56, %v1169_v57 }
 0x240   :  { %v1215_v58 = vpop.f32.mrf.mxu1 }
 0x241   :  { %v1216_v59 = vadd.f32 %v1215_v58, %v1214_v55 }
 0x243   :  { %v1039_v61 = vadd.f32 %v1216_v59, %v1169_v57 }
 0x245   :  { %v1193_v62 = vpack.c.bf16 %v1039_v61, %v1036_v60 }
 0x247   :  { %1194 = vst [vmem:[#allocation8] sm:$0xff] %v1193_v62  }
 0x248   :  { %1462 = shalt.err (!%p1459_p5)
}
 0x249   :  { %1063 = dma.vmem_to_hbm [thread:$0]  %s1058_s15, 128, %s1547_s5, [#allocation4], %s1484_s9, %s1484_s9, %s1485_s10  }
 0x24a   :  { %1475 = dma.done.wait [#allocation4], 128  }
 0x24b   :  { %1476 = vsyncadd [#allocation4], 4294967168 }
 0x24c   :  { %1067 = vsyncpa [#allocation3], 1 }
 0x24d   :  { %1068 = vsyncpa [#allocation6], 1 }
 0x24e   :  { %1069 = vsyncpa [#allocation4], 1 }

</bundles_post_ra>
